<compile_context>
chip_gen: v7x
topology: tpu7x:2x2x1
jax: 0.10.0
libtpu: 0.0.40
codegen_flags: <defaults>
</compile_context>

<pallas_src>
import functools

import jax
import jax.numpy as jnp
from jax.experimental import pallas as pl
from jax.experimental.pallas import tpu as pltpu


def _round_up(x: int, m: int) -> int:
    return (x + m - 1) // m * m


def _vmem_limit_bytes(tb: int, d: int, h: int) -> int:
    x_bytes = 2 * tb * d * 4              # double-buffered f32 x tiles
    h_bytes = tb * h * (4 + 2)            # f32 h + bf16 copy for the layer-2 MXU
    z_bytes = tb * 128 * 4                # layer-2 MXU result (col 0 = z)
    o_bytes = 2 * tb * 4                  # double-buffered (tb, 1) output tiles
    w_bytes = d * h * 2 + h * 4 + h * 128 * 2 + 4
    total = x_bytes + h_bytes + z_bytes + o_bytes + w_bytes
    # 2x headroom for compiler temporaries; >=32 MiB is cheap on v5e/v6e's
    # 128 MiB VMEM, <=48 MiB keeps allocator slack on v7x's 64 MiB.
    return int(min(max(2 * total, 32 * 1024 * 1024), 48 * 1024 * 1024))


def _discriminator_kernel(x_ref, w1_ref, b1_ref, w2p_ref, b2_ref, o_ref):
    # x:   (TB, D)   f32      w1: (D, 256)  bf16     b1: (1, 256) f32
    # w2p: (256,128) bf16 (col 0 = real w2, rest 0)  b2: (1, 1)   f32 (SMEM)
    # o:   (TB, 1)   f32

    # In-kernel bf16 cast of x (VPU; hidden under the pipelined DMA).
    x_bf16 = x_ref[...].astype(jnp.bfloat16)

    # Layer 1 on the MXU, f32 accumulation; bias + ReLU in f32 on the VPU.
    h = jnp.dot(x_bf16, w1_ref[...], preferred_element_type=jnp.float32)
    h = jnp.maximum(h + b1_ref[...], 0.0)                         # (TB, 256) f32

    # Layer 2 (256 -> 1) on the otherwise-idle MXU instead of a 256-lane
    # VPU-mul + XLU-reduce: w2 is zero-padded to (256, 128), column 0 of the
    # result carries z.  Extracting lane 0 is a cheap in-vreg select.
    z_full = jnp.dot(h.astype(jnp.bfloat16), w2p_ref[...],
                     preferred_element_type=jnp.float32)          # (TB, 128) f32
    z = z_full[:, 0:1] + b2_ref[0, 0]                             # (TB, 1)  f32

    # Numerically stable sigmoid: exp(-|z|) never overflows; exact divide.
    a = jnp.exp(-jnp.abs(z))
    sig = jnp.where(z >= 0.0, 1.0, a) / (1.0 + a)

    o_ref[...] = sig.astype(o_ref.dtype)                          # (TB, 1)


@functools.partial(jax.jit, static_argnames=("tb",))
def discriminator_forward(x, w1, b1, w2, b2, *, tb=4096):
    """x: (B, D) f32; w1: (D, 256); b1: (1, 256); w2: (1, 256); b2: (1, 1).
    Returns (B, 1) f32 in (0, 1)."""
    B, D = x.shape
    H = w1.shape[1]

    # Tile size: multiple of 8 (f32 sublane tiling); capped near B for tiny
    # batches, 4096 by default so the grid is not step-overhead bound.
    tb = min(tb, _round_up(max(B, 1), 8))
    tb = _round_up(tb, 8)
    num_tiles = pl.cdiv(B, tb)
    Bp = num_tiles * tb   # output rows (>= B); partial last x block reads OOB,
                          # those rows are garbage and dropped by the [:B] slice.

    # Weight prep only (tiny, one-shot): bf16 w1; w2 row zero-padded to a
    # (H, 128) bf16 operand for the layer-2 MXU matmul.  x is NOT touched.
    w1k = w1.astype(jnp.bfloat16)
    w2p = jnp.zeros((H, 128), jnp.bfloat16).at[:, 0].set(
        w2.reshape(H).astype(jnp.bfloat16))

    out = pl.pallas_call(
        _discriminator_kernel,
        out_shape=jax.ShapeDtypeStruct((Bp, 1), jnp.float32),
        grid=(num_tiles,),
        in_specs=[
            pl.BlockSpec((tb, D), lambda i: (i, 0)),             # x: streamed f32, double-buffered
            pl.BlockSpec((D, H), lambda i: (0, 0)),              # w1: VMEM-resident
            pl.BlockSpec((1, H), lambda i: (0, 0)),              # b1: VMEM-resident row
            pl.BlockSpec((H, 128), lambda i: (0, 0)),            # w2 padded: VMEM-resident
            pl.BlockSpec(memory_space=pltpu.MemorySpace.SMEM),   # b2: SMEM scalar
        ],
        out_specs=pl.BlockSpec((tb, 1), lambda i: (i, 0)),
        compiler_params=pltpu.CompilerParams(
            dimension_semantics=("parallel",),                   # megacore sharding on v7x
            vmem_limit_bytes=_vmem_limit_bytes(tb, D, H),
        ),
    )(x, w1k, b1, w2p, b2)

    return out[:B]


def init_params(key, data_dim, hidden=256):
    """PyTorch nn.Linear default init: U(-1/sqrt(fan_in), 1/sqrt(fan_in))."""
    k1, k2, k3, k4 = jax.random.split(key, 4)
    bound1 = 1.0 / jnp.sqrt(jnp.float32(data_dim))
    bound2 = 1.0 / jnp.sqrt(jnp.float32(hidden))
    # Stored transposed relative to torch's (out, in); w2 kept as a (1, H) row.
    w1 = jax.random.uniform(k1, (data_dim, hidden), jnp.float32, -bound1, bound1)
    b1 = jax.random.uniform(k2, (1, hidden), jnp.float32, -bound1, bound1)
    w2 = jax.random.uniform(k3, (1, hidden), jnp.float32, -bound2, bound2)
    b2 = jax.random.uniform(k4, (1, 1), jnp.float32, -bound2, bound2)
    return w1, b1, w2, b2


if __name__ == "__main__":
    key = jax.random.PRNGKey(0)
    k_params, k_x = jax.random.split(key)

    batch = 8
    data_dim = 32

    w1, b1, w2, b2 = init_params(k_params, data_dim)
    x = jax.random.normal(k_x, (batch, data_dim), jnp.float32)

    out = discriminator_forward(x, w1, b1, w2, b2)
    out = jax.block_until_ready(out)
    assert out.shape == (batch, 1)
    assert bool(jnp.all((out > 0.0) & (out < 1.0)))

    # Pure-f32 (torch-semantics) reference; tolerance covers the bf16 MXU path.
    ref_f32 = jax.nn.sigmoid(
        jnp.sum(jnp.maximum(x @ w1 + b1, 0.0) * w2, axis=-1, keepdims=True) + b2)
    assert jnp.allclose(out, ref_f32, atol=2e-2, rtol=2e-2)

    print("KERNEL_OK")
</pallas_src>

<mosaic_0001>
module attributes {stable_mosaic.version = 11 : i64} {
  func.func @_discriminator_kernel(%arg0: i32, %arg1: memref<8x32xf32, #tpu.memory_space<vmem>>, %arg2: memref<32x256xbf16, #tpu.memory_space<vmem>>, %arg3: memref<1x256xf32, #tpu.memory_space<vmem>>, %arg4: memref<256x128xbf16, #tpu.memory_space<vmem>>, %arg5: memref<1x1xf32, #tpu.memory_space<smem>>, %arg6: memref<8x1xf32, #tpu.memory_space<vmem>>) attributes {dimension_semantics = [#tpu.dimension_semantics<parallel>], iteration_bounds = array<i64: 1>, scalar_prefetch = 0 : i64, scratch_operands = 0 : i64, tpu.core_type = #tpu.core_type<tc>, window_params = [{transform_indices = @transform_0, window_bounds = array<i64: 8, 32>}, {pipeline_mode = #tpu.pipeline_mode<synchronous>, transform_indices = @transform_1, window_bounds = array<i64: 32, 256>}, {pipeline_mode = #tpu.pipeline_mode<synchronous>, transform_indices = @transform_2, window_bounds = array<i64: 1, 256>}, {pipeline_mode = #tpu.pipeline_mode<synchronous>, transform_indices = @transform_3, window_bounds = array<i64: 256, 128>}, {transform_indices = @transform_4, window_bounds = array<i64: 1, 1>}, {transform_indices = @transform_5, window_bounds = array<i64: 8, 1>}]} {
    %c0 = arith.constant 0 : index
    %c0_0 = arith.constant 0 : index
    %0 = vector.load %arg1[%c0, %c0_0] : memref<8x32xf32, #tpu.memory_space<vmem>>, vector<8x32xf32>
    %1 = arith.truncf %0 : vector<8x32xf32> to vector<8x32xbf16>
    %c0_1 = arith.constant 0 : index
    %c0_2 = arith.constant 0 : index
    %2 = vector.load %arg2[%c0_1, %c0_2] : memref<32x256xbf16, #tpu.memory_space<vmem>>, vector<32x256xbf16>
    %cst = arith.constant dense<0.000000e+00> : vector<8x256xf32>
    %3 = tpu.matmul %1, %2, %cst {dimension_numbers = #tpu.dot_dimension_numbers<[1], [0], [0], [1], [0, 0, 1, 1], [], []>} : vector<8x32xbf16>, vector<32x256xbf16>, vector<8x256xf32> -> vector<8x256xf32>
    %c0_3 = arith.constant 0 : index
    %c0_4 = arith.constant 0 : index
    %4 = vector.load %arg3[%c0_3, %c0_4] : memref<1x256xf32, #tpu.memory_space<vmem>>, vector<1x256xf32>
    %5 = vector.broadcast %4 : vector<1x256xf32> to vector<8x256xf32>
    %6 = arith.addf %3, %5 : vector<8x256xf32>
    %cst_5 = arith.constant 0.000000e+00 : f32
    %7 = vector.broadcast %cst_5 : f32 to vector<8x256xf32>
    %8 = arith.maximumf %6, %7 : vector<8x256xf32>
    %9 = arith.truncf %8 : vector<8x256xf32> to vector<8x256xbf16>
    %c0_6 = arith.constant 0 : index
    %c0_7 = arith.constant 0 : index
    %10 = vector.load %arg4[%c0_6, %c0_7] : memref<256x128xbf16, #tpu.memory_space<vmem>>, vector<256x128xbf16>
    %cst_8 = arith.constant dense<0.000000e+00> : vector<8x128xf32>
    %11 = tpu.matmul %9, %10, %cst_8 {dimension_numbers = #tpu.dot_dimension_numbers<[1], [0], [0], [1], [0, 0, 1, 1], [], []>} : vector<8x256xbf16>, vector<256x128xbf16>, vector<8x128xf32> -> vector<8x128xf32>
    %12 = vector.extract_strided_slice %11 {offsets = [0, 0], sizes = [8, 1], strides = [1, 1]} : vector<8x128xf32> to vector<8x1xf32>
    %c0_9 = arith.constant 0 : index
    %c0_10 = arith.constant 0 : index
    %13 = memref.load %arg5[%c0_9, %c0_10] : memref<1x1xf32, #tpu.memory_space<smem>>
    %14 = vector.broadcast %13 : f32 to vector<8x1xf32>
    %15 = arith.addf %12, %14 : vector<8x1xf32>
    %16 = math.absf %15 : vector<8x1xf32>
    %cst_11 = arith.constant 0.000000e+00 : f32
    %17 = vector.broadcast %cst_11 : f32 to vector<8x1xf32>
    %18 = arith.subf %17, %16 : vector<8x1xf32>
    %19 = math.exp %18 : vector<8x1xf32>
    %cst_12 = arith.constant 0.000000e+00 : f32
    %20 = vector.broadcast %cst_12 : f32 to vector<8x1xf32>
    %21 = arith.cmpf oge, %15, %20 : vector<8x1xf32>
    %cst_13 = arith.constant 1.000000e+00 : f32
    %22 = vector.broadcast %cst_13 : f32 to vector<8x1xf32>
    %23 = arith.select %21, %22, %19 : vector<8x1xi1>, vector<8x1xf32>
    %cst_14 = arith.constant 1.000000e+00 : f32
    %24 = vector.broadcast %cst_14 : f32 to vector<8x1xf32>
    %25 = arith.addf %24, %19 : vector<8x1xf32>
    %26 = arith.divf %23, %25 : vector<8x1xf32>
    %c0_15 = arith.constant 0 : index
    %c0_16 = arith.constant 0 : index
    %27 = vector.load %arg6[%c0_15, %c0_16] : memref<8x1xf32, #tpu.memory_space<vmem>>, vector<8x1xf32>
    tpu.vector_store %arg6[%c0_15, %c0_16], %26 {strides = array<i32>} : memref<8x1xf32, #tpu.memory_space<vmem>>, vector<8x1xf32>,
    return
  }
  func.func @transform_0(%arg0: i32) -> (i32, i32) {
    %c0_i32 = arith.constant 0 : i32
    %c0_i32_0 = arith.constant 0 : i32
    return %arg0, %c0_i32 : i32, i32
  }
  func.func @transform_1(%arg0: i32) -> (i32, i32) {
    %c0_i32 = arith.constant 0 : i32
    %c0_i32_0 = arith.constant 0 : i32
    %c0_i32_1 = arith.constant 0 : i32
    return %c0_i32, %c0_i32_0 : i32, i32
  }
  func.func @transform_2(%arg0: i32) -> (i32, i32) {
    %c0_i32 = arith.constant 0 : i32
    %c0_i32_0 = arith.constant 0 : i32
    %c0_i32_1 = arith.constant 0 : i32
    return %c0_i32, %c0_i32_0 : i32, i32
  }
  func.func @transform_3(%arg0: i32) -> (i32, i32) {
    %c0_i32 = arith.constant 0 : i32
    %c0_i32_0 = arith.constant 0 : i32
    %c0_i32_1 = arith.constant 0 : i32
    return %c0_i32, %c0_i32_0 : i32, i32
  }
  func.func @transform_4(%arg0: i32) -> (i32, i32) {
    %c0_i32 = arith.constant 0 : i32
    %c0_i32_0 = arith.constant 0 : i32
    %c0_i32_1 = arith.constant 0 : i32
    return %c0_i32, %c0_i32_0 : i32, i32
  }
  func.func @transform_5(%arg0: i32) -> (i32, i32) {
    %c0_i32 = arith.constant 0 : i32
    %c0_i32_0 = arith.constant 0 : i32
    return %arg0, %c0_i32 : i32, i32
  }
}

</mosaic_0001>

<bundles_post_ra>
// kernel: discriminator_forward.1
= control target key start
LH: loop header
LB: loop body
LE: loop exit
PB: predicated region body
PF: predicated region fallthrough
CT: control target
= control target key end

     0   :  { %v365_v1 = vmov 0   ;;  %vm60_vm0 = vcmask 261120   ;;  %v30_v23 = vlaneseq  ;;  %vm289_vm2 = vcmask 7168   ;;  %s468_s1 = inlined_call_operand.vmem [shape: bf16[32,256], index: 1, kind: input, shape index: {}]   ;;  %s469_s0 = inlined_call_operand.vmem [shape: f32[8,32], index: 0, kind: input, shape index: {}]   ;;  %s470_s3 = inlined_call_operand.vmem [shape: bf16[256,128], index: 3, kind: input, shape index: {}]   ;;  %s471_s2 = inlined_call_operand.vmem [shape: f32[1,256], index: 2, kind: input, shape index: {}]   ;;  %s472_s4 = inlined_call_operand.<no memory space> [shape: f32[1,1], index: 4, kind: input, shape index: {}]   ;;  %s473_s5 = inlined_call_operand.vmem [shape: f32[8,1], index: 5, kind: output, shape index: {}]  }
   0x1   :  { %v339_v0 = vld [vmem:[%s468_s1 + $0x4] ss:$8 sps:$4 sm:$0xff]   ;;  %96 = vmatprep.mubr.bf16.mxu0 %v365_v1  ;;  %v341_v2 = vld [vmem:[%s468_s1] ss:$8 sps:$4 sm:$0xff]   ;;  %v342_v3 = vld [vmem:[%s468_s1 + $0x14] ss:$8 sps:$4 sm:$0xff]   ;;  %v278_v42 = vstv %s472_s4 }
   0x2   :  { %64 = vmatprep.subr.bf16.mxu0 %v339_v0  ;;  %v344_v4 = vld [vmem:[%s468_s1 + $0x10] ss:$8 sps:$4 sm:$0xff]   ;;  %v22_v5 = vld [vmem:[%s469_s0] sm:$0xff]  ;;  %v347_v8 = vld [vmem:[%s470_s3 + $0x48] sm:$0xff]   ;;  %v31_v24 = vshrl.u32 %v30_v23, 7 }
   0x3   :  { %65 = vmatpush1.bf16.msra.mxu0 %v341_v2  ;;  %v345_v6 = vld [vmem:[%s470_s3 + $0x40] sm:$0xff]   ;;  %v23_v9 = vpack.c.bf16 %v22_v5, %v22_v5  ;;  %v348_v10 = vld [vmem:[%s470_s3 + $0x8] sm:$0xff]   ;;  %v349_v11 = vld [vmem:[%s470_s3 + $0x50] sm:$0xff]  }
   0x4   :  { %66 = vmatprep.subr.bf16.mxu0 %v342_v3  ;;  %v346_v7 = vld [vmem:[%s470_s3] sm:$0xff]   ;;  %316 = vmatprep.subr.bf16.mxu1 %v345_v6  ;;  %v350_v12 = vld [vmem:[%s470_s3 + $0x10] sm:$0xff]   ;;  %v351_v13 = vld [vmem:[%s470_s3 + $0x58] sm:$0xff]   ;;  %v32_v25 = vsub.s32 0, %v31_v24  ;;  %v36_v27 = vsub.s32 1, %v31_v24 }
   0x5   :  { %317 = vmatpush3.bf16.msra.mxu1 %v346_v7  ;;  %v352_v14 = vld [vmem:[%s470_s3 + $0x18] sm:$0xff]   ;;  %v353_v15 = vld [vmem:[%s470_s3 + $0x60] sm:$0xff]   ;;  %v355_v17 = vld [vmem:[%s470_s3 + $0x68] sm:$0xff]  }
   0x6   :  { %318 = vmatprep.subr.bf16.mxu1 %v347_v8  ;;  %v354_v16 = vld [vmem:[%s470_s3 + $0x20] sm:$0xff]   ;;  %v356_v18 = vld [vmem:[%s470_s3 + $0x28] sm:$0xff]   ;;  %v357_v19 = vld [vmem:[%s470_s3 + $0x70] sm:$0xff]  }
   0x7   :  { %67 = vmatpush1.bf16.msra.mxu0 %v344_v4  ;;  %v358_v20 = vld [vmem:[%s470_s3 + $0x30] sm:$0xff]   ;;  %v359_v21 = vld [vmem:[%s470_s3 + $0x78] sm:$0xff]   ;;  %v28_v26 = vld [vmem:[%s471_s2] sm:$0x3] }
   0x8   :  { %v360_v22 = vld [vmem:[%s470_s3 + $0x38] sm:$0xff]   ;;  %v33_v28 = vrot.slane %v28_v26, %v32_v25  ;;  %v37_v29 = vrot.slane %v28_v26, %v36_v27 }
   0x9   :  { %319 = vmatpush3.bf16.msra.mxu1 %v348_v10 }
   0xa   :  { %299 = vmatmul.mubr.msk.bf16.vlgmr.msra.gmra.mrb[0].mxu0 %vm60_vm0, %v23_v9  ;;  %320 = vmatprep.subr.bf16.mxu1 %v349_v11 }
   0xd   :  { %321 = vmatpush3.bf16.msra.mxu1 %v350_v12 }
   0xe   :  { %322 = vmatprep.subr.bf16.mxu1 %v351_v13 }
  0x11   :  { %323 = vmatpush3.bf16.msra.mxu1 %v352_v14 }
  0x12   :  { %324 = vmatprep.subr.bf16.mxu1 %v353_v15 }
  0x15   :  { %325 = vmatpush3.bf16.msra.mxu1 %v354_v16 }
  0x16   :  { %326 = vmatprep.subr.bf16.mxu1 %v355_v17 }
  0x19   :  { %327 = vmatpush3.bf16.msra.mxu1 %v356_v18 }
  0x1a   :  { %328 = vmatprep.subr.bf16.mxu1 %v357_v19 }
  0x1d   :  { %329 = vmatpush3.bf16.msra.mxu1 %v358_v20 }
  0x1e   :  { %330 = vmatprep.subr.bf16.mxu1 %v359_v21 }
  0x21   :  { %331 = vmatpush3.bf16.msra.mxu1 %v360_v22 }
  0xdd   :  { %v98_v30 = vpop.f32.mrb[0].mxu0 }
  0xde   :  { %v99_v31 = vadd.f32 %v98_v30, %v33_v28  ;;  %v100_v32 = vpop.f32.mrb[1].mxu0 }
  0xdf   :  { %v101_v33 = vadd.f32 %v100_v32, %v37_v29  ;;  %v102_v34 = vpop.f32.mrb[2].mxu0 }
  0xe0   :  { %v105_v35 = vmax.f32 %v99_v31, 0.0  ;;  %v103_v36 = vpop.f32.mrb[3].mxu0 }
  0xe1   :  { %v106_v37 = vmax.f32 %v101_v33, 0.0 }
  0xe2   :  { %v107_v39 = vpack.c.bf16 %v105_v35, %v105_v35 }
  0xe3   :  { %v108_v38 = vpack.c.bf16 %v106_v37, %v106_v37 }
  0xe5   :  { %269 = vmatprep.mubr.bf16.mxu1 %v108_v38 }
  0xe6   :  { %270 = vmatmul.mubr.bf16.vlgmr.msra.gmra.mrb[0].mxu1 %v107_v39 }
 0x1b9   :  { %v332_v40 = vpop.f32.mrb[0].mxu1 }
 0x1ba   :  { %v333_v41 = vpop.f32.mrb[1].mxu1 }
 0x1bb   :  { %v334_v43 = vadd.f32 %v333_v41, %v332_v40  ;;  %v335_v44 = vpop.f32.mrb[2].mxu1 }
 0x1bc   :  { %v336_v45 = vpop.f32.mrb[3].mxu1 }
 0x1bd   :  { %v279_v46 = vadd.f32 %v334_v43, %v278_v42 }
 0x1bf   :  { %v280_v47 = vand.u32 2147483647, %v279_v46  ;;  %vm284_vm1 = vcmp.ge.f32.partialorder %v279_v46, 0.0 }
 0x1c1   :  { %v281_v48 = vsub.f32 0.0, %v280_v47 }
 0x1c3   :  { %v282_v49 = vmul.f32 1.442695, %v281_v48 }
 0x1c5   :  { %361 = vpow2.f32 %v282_v49 }
 0x1cf   :  { %v362_v50 = vpop.eup %361 }
 0x1d0   :  { %v286_v51 = vadd.f32 1.0, %v362_v50  ;;  %v285_v53 = vsel %vm284_vm1, 1.0, %v362_v50 }
 0x1d2   :  { %363 = vrcp.f32 %v286_v51 }
 0x1dc   :  { %v364_v52 = vpop.eup %363 }
 0x1dd   :  { %v288_v54 = vmul.f32 %v364_v52, %v285_v53 }
 0x1df   :  { %290 = vst.msk [vmem:[%s473_s5] sm:$0xff] %vm289_vm2, %v288_v54 }

</bundles_post_ra>
